<compile_context>
chip_gen: v7x
topology: tpu7x:2x2x1
jax: 0.10.0
libtpu: 0.0.40
codegen_flags: <defaults>
</compile_context>

<pallas_src>
import functools

import numpy as np
import jax
import jax.numpy as jnp
from jax.experimental import pallas as pl
from jax.experimental.pallas import tpu as pltpu


def _legs_eval_matrix(N: int, L: int) -> np.ndarray:
    """Deterministic HiPPO-LegS evaluation matrix E (what init_leg_s registers).

    E[t, n] = sqrt(2n+1) * P_n(2 * t/(L-1) - 1), Legendre via recurrence.
    """
    vals = np.linspace(0.0, 1.0, L)
    x = 2.0 * vals - 1.0                      # (L,)
    P = np.zeros((N, L), dtype=np.float64)
    P[0] = 1.0
    if N > 1:
        P[1] = x
    for n in range(1, N - 1):
        P[n + 1] = ((2 * n + 1) * x * P[n] - n * P[n - 1]) / (n + 1)
    B = np.sqrt(2.0 * np.arange(N) + 1.0)     # LegS B vector
    return (B[:, None] * P).T.astype(np.float32)   # (L, N)


# --------------------------------------------------------------------------
# Generation-aware tuning (review items #2, #3, #4, #5, #6).
# --------------------------------------------------------------------------
@functools.lru_cache(maxsize=1)
def _tpu_tuning():
    gen = "unknown"
    try:
        kind = jax.devices()[0].device_kind.lower()
        if "v5" in kind and ("lite" in kind or "v5e" in kind):
            gen = "v5e"
        elif "v6" in kind:
            gen = "v6e"
        elif "v7" in kind:
            gen = "v7x"
    except Exception:
        pass
    table = {
        # single_block_bytes : E size below which one grid point / one DMA wins.
        # min_stream_tiles   : keep >= this many tiles so megacore sharding has
        #                      several blocks per TensorCore (v7x only).
        # stream_buffers     : pipeline depth on the streaming E input.
        "v5e":     dict(single_block_bytes=6 << 20,  min_stream_tiles=1, stream_buffers=3),
        "v6e":     dict(single_block_bytes=10 << 20, min_stream_tiles=1, stream_buffers=None),
        "v7x":     dict(single_block_bytes=1 << 20,  min_stream_tiles=8, stream_buffers=None),
        "unknown": dict(single_block_bytes=4 << 20,  min_stream_tiles=4, stream_buffers=None),
    }
    return table[gen]


def _make_block_spec(block_shape, index_map, buffers=None):
    """BlockSpec with optional deeper pipelining; falls back cleanly if this
    JAX build does not accept pipeline_mode / pl.Buffered at construction."""
    if buffers is not None and buffers != 2 and hasattr(pl, "Buffered"):
        try:
            return pl.BlockSpec(block_shape, index_map,
                                pipeline_mode=pl.Buffered(buffers))
        except TypeError:
            pass
    return pl.BlockSpec(block_shape, index_map)


# --------------------------------------------------------------------------
# Kernels. c_ref is always presented as (D, N) (the (None, D, N) BlockSpec
# squeezes the time axis when the full (L, D, N) parameter is passed), so the
# transposed contraction is done on the MXU via dot_general — no host-side
# transpose or c[-1] slice ops (review item #8).
# --------------------------------------------------------------------------
def _decode_whole_kernel(e_ref, c_ref, o_ref, *, padding, T):
    # e_ref : (L, N) full evaluation matrix, resident in VMEM (single DMA)
    # c_ref : (D, N) final coefficients c[-1]
    # o_ref : (T, D) decoded timeseries
    e_dec = e_ref[pl.ds(padding, T), :]       # padding slice done in VMEM, no HBM copy
    o_ref[...] = jax.lax.dot_general(
        e_dec, c_ref[...],
        dimension_numbers=(((1,), (1,)), ((), ())),   # contract shared N axis
        preferred_element_type=jnp.float32,
    ).astype(o_ref.dtype)


def _decode_tiled_kernel(e_ref, c_ref, o_ref):
    # e_ref : (tile_t, N) tile of the *full* E (padding rows included)
    # c_ref : (D, N)      resident final coefficients c[-1]
    # o_ref : (tile_t, D) tile of the full (L, D) product
    o_ref[...] = jax.lax.dot_general(
        e_ref[...], c_ref[...],
        dimension_numbers=(((1,), (1,)), ((), ())),
        preferred_element_type=jnp.float32,
    ).astype(o_ref.dtype)


# --------------------------------------------------------------------------
# One-off (init-time) input preparation (review item #7): extract c[-1] and
# optionally cast E / c[-1] to a narrower compute dtype OUTSIDE the forward,
# so a bf16 E stream genuinely halves HBM traffic instead of adding a cast
# round trip per call. f32 accumulation is kept inside the kernels.
# --------------------------------------------------------------------------
def prepare_hippo_inputs(E, c, compute_dtype=None):
    c_last = c[-1] if c.ndim == 3 else c          # (D, N)
    if compute_dtype is not None:
        E = E.astype(compute_dtype)
        c_last = c_last.astype(compute_dtype)
    return E, c_last


def hippo_timeseries_forward(E, c, padding, *,
                             tile_bytes=4 * 1024 * 1024,
                             max_tile_t=8192,
                             single_block_bytes=None,
                             min_stream_tiles=None,
                             stream_buffers=None,
                             out_dtype=None):
    """Pallas implementation of HiPPOTimeseries.forward().

    `c` may be the full (L, D, N) parameter (c[-1] is selected in-kernel via a
    2 KiB BlockSpec DMA) or a pre-extracted / pre-cast (D, N) array from
    prepare_hippo_inputs().
    """
    tuning = _tpu_tuning()
    if single_block_bytes is None:
        single_block_bytes = tuning["single_block_bytes"]
    if min_stream_tiles is None:
        min_stream_tiles = tuning["min_stream_tiles"]
    if stream_buffers is None:
        stream_buffers = tuning["stream_buffers"]

    L, N = E.shape
    if c.ndim == 3:
        Lc, D, Nc = c.shape
        assert (Lc, Nc) == (L, N)
        c_block = (None, D, N)                      # squeeze time axis in-kernel
        c_index = lambda i: (L - 1, 0, 0)           # only c[-1] contributes
    else:
        D, Nc = c.shape
        assert Nc == N
        c_block = (D, N)
        c_index = lambda i: (0, 0)
    T = L - 2 * padding
    out_dtype = E.dtype if out_dtype is None else out_dtype
    out_isz = np.dtype(out_dtype).itemsize
    c_bytes = D * N * c.dtype.itemsize
    e_bytes = L * N * E.dtype.itemsize

    if e_bytes <= single_block_bytes:
        # ---------------- single-block fast path --------------------------
        # One grid point: one DMA of E, one MXU pass, one output DMA.
        # (On v7x the threshold is small so medium problems use both TCs via
        #  the tiled "parallel" path instead.)
        kernel = functools.partial(_decode_whole_kernel, padding=padding, T=T)
        need = 2 * e_bytes + 2 * T * D * out_isz + 2 * c_bytes  # 2x: double buffers
        vmem_limit = None if need <= (12 << 20) else int(need + (8 << 20))
        return pl.pallas_call(
            kernel,
            out_shape=jax.ShapeDtypeStruct((T, D), out_dtype),
            grid_spec=pltpu.PrefetchScalarGridSpec(
                num_scalar_prefetch=0,
                grid=(1,),
                in_specs=[
                    pl.BlockSpec((L, N), lambda i: (0, 0)),       # whole E
                    pl.BlockSpec(c_block, c_index),               # c[-1] as (D, N)
                ],
                out_specs=pl.BlockSpec((T, D), lambda i: (0, 0)),
            ),
            compiler_params=pltpu.CompilerParams(
                dimension_semantics=("arbitrary",),
                vmem_limit_bytes=vmem_limit),
        )(E, c)

    # ---------------- tiled streaming path (large L) ----------------------
    # Stream the FULL E (no host slice copy of the dominant stream); tiles are
    # sized to ~tile_bytes of E (2-4 MiB class) so per-step overhead is noise,
    # then capped so v7x keeps several blocks per TensorCore.
    row_bytes = N * E.dtype.itemsize
    tile_t = max(16, min(max_tile_t, tile_bytes // row_bytes, L))
    if min_stream_tiles and min_stream_tiles > 1:
        tile_t = min(tile_t, max(16, -(-L // min_stream_tiles)))  # keep grid_t >= min
    tile_t = max(16, (tile_t // 16) * 16)          # sublane-safe incl. bf16 packing
    grid_t = pl.cdiv(L, tile_t)                    # tail block: OOB rows are row-local
    #                                              # and dropped/stripped (see header)

    bufs = stream_buffers if stream_buffers else 2
    need = bufs * tile_t * row_bytes + 2 * tile_t * D * out_isz + 2 * c_bytes
    vmem_limit = None if need <= (12 << 20) else int(need + (8 << 20))

    def _run(buffers):
        return pl.pallas_call(
            _decode_tiled_kernel,
            out_shape=jax.ShapeDtypeStruct((L, D), out_dtype),
            grid_spec=pltpu.PrefetchScalarGridSpec(
                num_scalar_prefetch=0,
                grid=(grid_t,),
                in_specs=[
                    # E row tiles: the only streaming input; deeper buffering on v5e.
                    _make_block_spec((tile_t, N), lambda i: (i, 0), buffers),
                    pl.BlockSpec(c_block, c_index),               # c[-1], resident
                ],
                out_specs=pl.BlockSpec((tile_t, D), lambda i: (i, 0)),
            ),
            compiler_params=pltpu.CompilerParams(
                # both v7x TensorCores split the E stream
                dimension_semantics=("parallel",),
                vmem_limit_bytes=vmem_limit),
        )(E, c)

    if stream_buffers not in (None, 2):
        try:
            out_full = _run(stream_buffers)
        except Exception:
            # Deeper buffering rejected on this build/config (or VMEM-tight):
            # retry with default double-buffering. (Under jit this guard is a
            # no-op at trace time and the tuned path is used directly.)
            out_full = _run(None)
    else:
        out_full = _run(None)

    # Padding slice on the tiny (L, D) product instead of the big E input.
    return jax.lax.slice(out_full, (padding, 0), (padding + T, D))


if __name__ == "__main__":
    # Small shapes consistent with the module's forward:
    #   original timeseries f: (T, D) = (32, 4), HiPPO order N = 128, padding = 16
    N, D, T, padding = 128, 4, 32, 16
    L = T + 2 * padding

    # Buffer E exactly as init_leg_s would build it (deterministic, in-script).
    E = jnp.asarray(_legs_eval_matrix(N, L))                      # (L, N)

    # Parameter c: deterministic random init with the right shape (L, D, N).
    # TODO(synk): encode_leg_s is __init__-time parameter construction (a scan
    # over A_t c_{t-1} + B_t f_t), not part of the forward hot path; c is a
    # learnable Parameter so we seed it with PRNGKey(0) instead.
    c = 0.02 * jax.random.normal(jax.random.PRNGKey(0), (L, D, N), dtype=jnp.float32)

    # Pure-JAX reference replicating the torch broadcasting semantics.
    ref = jnp.matmul(E, c[-1].T)[padding:padding + T]             # (T, D)

    # 1) Default routing (single-block at this size), full (L, D, N) c,
    #    c[-1] selected in-kernel.
    out = jax.block_until_ready(hippo_timeseries_forward(E, c, padding))
    assert out.shape == (T, D), out.shape
    np.testing.assert_allclose(np.asarray(out), np.asarray(ref), rtol=1e-5, atol=1e-5)

    # 2) Forced tiled streaming path (tile_t = 16 divides L = 64 evenly),
    #    exercises the "parallel" grid + resident c[-1] block.
    out_tiled = jax.block_until_ready(
        hippo_timeseries_forward(E, c, padding, max_tile_t=16, single_block_bytes=0))
    np.testing.assert_allclose(np.asarray(out_tiled), np.asarray(ref),
                               rtol=1e-5, atol=1e-5)

    # 3) Forced tiled path with a NON-dividing tile (48 on L = 64) and a
    #    pre-extracted (D, N) coefficient array: exercises tail-block masking
    #    and the 2-D c branch.
    E32, c_last32 = prepare_hippo_inputs(E, c)
    out_tail = jax.block_until_ready(
        hippo_timeseries_forward(E32, c_last32, padding,
                                 max_tile_t=48, single_block_bytes=0,
                                 min_stream_tiles=1))
    np.testing.assert_allclose(np.asarray(out_tail), np.asarray(ref),
                               rtol=1e-5, atol=1e-5)

    # 4) Init-time bf16 preparation (halves the dominant E stream on v5e/v6e);
    #    f32 accumulation + f32 output, compared with a loose bf16 tolerance.
    Ebf, c_last_bf = prepare_hippo_inputs(E, c, compute_dtype=jnp.bfloat16)
    out_bf = jax.block_until_ready(
        hippo_timeseries_forward(Ebf, c_last_bf, padding, out_dtype=jnp.float32))
    np.testing.assert_allclose(np.asarray(out_bf), np.asarray(ref),
                               rtol=5e-2, atol=5e-2)

    print("KERNEL_OK")
</pallas_src>

<mosaic_0001>
module attributes {stable_mosaic.version = 11 : i64} {
  func.func @_decode_whole_kernel(%arg0: i32, %arg1: memref<64x128xf32, #tpu.memory_space<vmem>>, %arg2: memref<1x4x128xf32, #tpu.memory_space<vmem>>, %arg3: memref<32x4xf32, #tpu.memory_space<vmem>>) attributes {dimension_semantics = [#tpu.dimension_semantics<arbitrary>], iteration_bounds = array<i64: 1>, scalar_prefetch = 0 : i64, scratch_operands = 0 : i64, tpu.core_type = #tpu.core_type<tc>, window_params = [{pipeline_mode = #tpu.pipeline_mode<synchronous>, transform_indices = @transform_0, window_bounds = array<i64: 64, 128>}, {transform_indices = @transform_1, window_bounds = array<i64: 1, 4, 128>}, {pipeline_mode = #tpu.pipeline_mode<synchronous>, transform_indices = @transform_2, window_bounds = array<i64: 32, 4>}]} {
    %c16 = arith.constant 16 : index
    %c0 = arith.constant 0 : index
    %0 = vector.load %arg1[%c16, %c0] : memref<64x128xf32, #tpu.memory_space<vmem>>, vector<32x128xf32>
    %c0_0 = arith.constant 0 : index
    %c0_1 = arith.constant 0 : index
    %c0_2 = arith.constant 0 : index
    %1 = vector.load %arg2[%c0_0, %c0_1, %c0_2] : memref<1x4x128xf32, #tpu.memory_space<vmem>>, vector<1x4x128xf32>
    %2 = vector.shape_cast %1 : vector<1x4x128xf32> to vector<4x128xf32>
    %cst = arith.constant dense<0.000000e+00> : vector<32x4xf32>
    %3 = tpu.matmul %0, %2, %cst {dimension_numbers = #tpu.dot_dimension_numbers<[1], [1], [0], [0], [0, 0, 1, 0], [], []>} : vector<32x128xf32>, vector<4x128xf32>, vector<32x4xf32> -> vector<32x4xf32>
    %c0_3 = arith.constant 0 : index
    %c0_4 = arith.constant 0 : index
    %4 = vector.load %arg3[%c0_3, %c0_4] : memref<32x4xf32, #tpu.memory_space<vmem>>, vector<32x4xf32>
    tpu.vector_store %arg3[%c0_3, %c0_4], %3 {strides = array<i32>} : memref<32x4xf32, #tpu.memory_space<vmem>>, vector<32x4xf32>,
    return
  }
  func.func @transform_0(%arg0: i32) -> (i32, i32) {
    %c0_i32 = arith.constant 0 : i32
    %c0_i32_0 = arith.constant 0 : i32
    %c0_i32_1 = arith.constant 0 : i32
    return %c0_i32, %c0_i32_0 : i32, i32
  }
  func.func @transform_1(%arg0: i32) -> (i32, i32, i32) {
    %c63_i32 = arith.constant 63 : i32
    %c0_i32 = arith.constant 0 : i32
    %c0_i32_0 = arith.constant 0 : i32
    %c0_i32_1 = arith.constant 0 : i32
    return %c63_i32, %c0_i32, %c0_i32_0 : i32, i32, i32
  }
  func.func @transform_2(%arg0: i32) -> (i32, i32) {
    %c0_i32 = arith.constant 0 : i32
    %c0_i32_0 = arith.constant 0 : i32
    %c0_i32_1 = arith.constant 0 : i32
    return %c0_i32, %c0_i32_0 : i32, i32
  }
}

</mosaic_0001>

<bundles_post_ra>
// kernel: tpu_custom_call.1
= control target key start
LH: loop header
LB: loop body
LE: loop exit
PB: predicated region body
PF: predicated region fallthrough
CT: control target
= control target key end

     0   :  { %7 = vsyncpa [#allocation3], 0  ;;  %s261_s0 = inlined_call_operand.hbm [shape: f32[64,128], index: 0, kind: input, shape index: {}]   ;;  %s262_s1 = inlined_call_operand.hbm [shape: f32[64,4,128], index: 1, kind: input, shape index: {}]   ;;  %s263_s2 = inlined_call_operand.vmem [shape: f32[32,4], index: 2, kind: output, shape index: {}]  }
   0x1   :  { %8 = vsyncpa [#allocation5], 0  ;;  %s209_s9 = smov [#allocation2]   ;;  %s158_s13 = scalar_lea.hbm %s261_s0, 1024 }
   0x2   :  { %s14_s10 = sshll.u32 %s209_s9, 4  ;;  %p159_p0 = scmp.ne.s32.totalorder %s261_s0, %s158_s13  ;;  %s15_s10 = int_to_ptr.vmem [resolvable:$true] %s14_s10 }
   0x3   :  { %p162_p1 = scmp.lt.u32.totalorder %s158_s13, %s261_s0 }
   0x5   :  { %p164_p2 = pnand %p162_p1, %p159_p0 }
   0x7   :  { %167 = shalt.err (!%p164_p2)
}
   0x8   :  { %s168_s18 = scalar_lea.vmem %s15_s10, 1024  ;;  %p173_p4 = scmp.lt.s32.totalorder %s15_s10, %s15_s10 }
   0x9   :  { %p169_p3 = scmp.ne.s32.totalorder %s15_s10, %s168_s18  ;;  %p174_p5 = scmp.lt.s32.totalorder %s168_s18, %s168_s18 }
   0xb   :  { %p175_p6 = por %p174_p5, %p173_p4 }
   0xd   :  { %p176_p7 = pnand %p175_p6, %p169_p3 }
   0xf   :  { %179 = shalt.err (!%p176_p7)
}
  0x10   :  { %s210_s19 = smov 128   ;;  %s211_s20 = smov 8  }
  0x11   :  { %20 = dma.hbm_to_vmem [thread:$0]  %s261_s0, 1024, %s15_s10, [#allocation3], %s210_s19, %s210_s19, %s211_s20  }
  0x12   :  { %s26_s25 = scalar_lea.hbm %s262_s1, 4032  ;;  %s212_s26 = smov [#allocation4]  }
  0x13   :  { %s28_s27 = sshll.u32 %s212_s26, 4  ;;  %s204_s30 = scalar_lea.hbm %s262_s1, 4096  ;;  %s29_s27 = int_to_ptr.vmem [resolvable:$true] %s28_s27 }
  0x14   :  { %p181_p8 = scmp.ne.s32.totalorder %s26_s25, %s204_s30  ;;  %p183_p9 = scmp.lt.u32.totalorder %s26_s25, %s262_s1 }
  0x15   :  { %p184_p10 = scmp.lt.u32.totalorder %s204_s30, %s204_s30  ;;  %p186_p12 = scmp.lt.u32.totalorder %s204_s30, %s26_s25 }
  0x17   :  { %p185_p11 = por %p184_p10, %p183_p9 }
  0x19   :  { %p187_p13 = por %p186_p12, %p185_p11 }
  0x1b   :  { %p188_p0 = pnand %p187_p13, %p181_p8 }
  0x1d   :  { %191 = shalt.err (!%p188_p0)
}
  0x1e   :  { %s192_s0 = scalar_lea.vmem %s29_s27, 64  ;;  %p197_p2 = scmp.lt.s32.totalorder %s29_s27, %s29_s27 }
  0x1f   :  { %p193_p1 = scmp.ne.s32.totalorder %s29_s27, %s192_s0  ;;  %p198_p3 = scmp.lt.s32.totalorder %s192_s0, %s192_s0 }
  0x21   :  { %p199_p4 = por %p198_p3, %p197_p2 }
  0x23   :  { %p200_p5 = pnand %p199_p4, %p193_p1 }
  0x25   :  { %203 = shalt.err (!%p200_p5)
}
  0x26   :  { %31 = dma.hbm_to_vmem [thread:$0]  %s26_s25, 64, %s29_s27, [#allocation5]  }
  0x27   :  { %205 = dma.done.wait [#allocation3], 1024  }
  0x28   :  { %206 = vsyncadd [#allocation3], 4294966272 }
  0x29   :  { %207 = dma.done.wait [#allocation5], 64  }
  0x2a   :  { %208 = vsyncadd [#allocation5], 4294967232  ;;  %v42_v0 = vld [vmem:[#allocation4] sm:$0xf]  ;;  %v38_v1 = vld [vmem:[#allocation2 + $0x10] sm:$0xff]  ;;  %vm128_vm0 = vcmask 31744  }
  0x2b   :  { %v40_v2 = vld [vmem:[#allocation2 + $0x20] sm:$0xff]  ;;  %144 = vmatprep.subr.mxu0 %v42_v0  ;;  %152 = vmatprep.subr.mxu1 %v42_v0  ;;  %v39_v3 = vld [vmem:[#allocation2 + $0x18] sm:$0xff]  ;;  %v41_v4 = vld [vmem:[#allocation2 + $0x28] sm:$0xff] }
  0x2c   :  { %145 = vmatpush3.xpose.msra.mxu0 %v42_v0  ;;  %153 = vmatpush3.xpose.msra.mxu1 %v42_v0 }
  0x2d   :  { %146 = vmatprep.mubr.f32.mxu0 %v38_v1  ;;  %149 = vmatprep.mubr.f32.mxu1 %v40_v2 }
  0x2f   :  { %147 = vmatmul.mubr.f32.vlgmr.msra.gmra.mrb[0].mxu0 %v39_v3  ;;  %150 = vmatmul.mubr.f32.vlgmr.msra.gmra.mrb[0].mxu1 %v41_v4 }
 0x102   :  { %v148_v5 = vpop.f32.mrb[0].mxu0  ;;  %v151_v6 = vpop.f32.mrb[0].mxu1 }
 0x103   :  { %130 = vst.msk [vmem:[%s263_s2 + $0x8] sm:$0xff] %vm128_vm0, %v148_v5  ;;  %132 = vst.msk [vmem:[%s263_s2 + $0x18] sm:$0xff] %vm128_vm0, %v151_v6  ;;  %v109_v7 = vpop.f32.mrb[1].mxu0  ;;  %v119_v8 = vpop.f32.mrb[1].mxu1 }
 0x104   :  { %129 = vst.msk [vmem:[%s263_s2] sm:$0xff] %vm128_vm0, %v109_v7  ;;  %131 = vst.msk [vmem:[%s263_s2 + $0x10] sm:$0xff] %vm128_vm0, %v119_v8 }
 0x105   :  { %137 = vsyncpa [#allocation3], 1 }
 0x106   :  { %138 = vsyncpa [#allocation5], 1 }

</bundles_post_ra>
